<compile_context>
chip_gen: v5e
topology: v5e:2x2
jax: 0.10.0
libtpu: 0.0.40
codegen_flags: <defaults>
</compile_context>

<pallas_src>
import functools
import math

import jax
import jax.numpy as jnp
from jax.experimental import pallas as pl
from jax.experimental.pallas import tpu as pltpu

LN_EPS = 1e-5  # nn.LayerNorm default


def _cdiv(a, b):
    return -(-a // b)


def _erf(x):
    # Abramowitz & Stegun 7.1.26 rational approximation (max abs err ~1.5e-7),
    # built only from ops with guaranteed Mosaic lowerings (exp, mul, add).
    # TODO(synk): pl.reciprocal(1 + p*ax, approx=True) would move this divide to
    # the EUP slot, but must be re-verified against the 1e-3 tolerance first.
    p = 0.3275911
    a1, a2, a3, a4, a5 = 0.254829592, -0.284496736, 1.421413741, -1.453152027, 1.061405429
    sgn = jnp.where(x >= 0.0, 1.0, -1.0)
    ax = jnp.abs(x)
    t = 1.0 / (1.0 + p * ax)
    poly = ((((a5 * t + a4) * t + a3) * t + a2) * t + a1) * t
    return sgn * (1.0 - poly * jnp.exp(-ax * ax))


def _gelu_exact(x):
    # PyTorch nn.GELU() default ("none") = exact erf-based GELU.
    return 0.5 * x * (1.0 + _erf(x * (1.0 / math.sqrt(2.0))))


def _layer_norm_lastdim(x, g, b):
    mu = jnp.mean(x, axis=-1, keepdims=True)
    var = jnp.mean(jnp.square(x - mu), axis=-1, keepdims=True)
    return (x - mu) * jax.lax.rsqrt(var + LN_EPS) * g + b


def baseline_v2_kernel(
    x_ref, bias_ref,
    w1_ref, b1_ref, w2_ref, b2_ref,          # pointwise_conv
    g1_ref, be1_ref,                          # ln1
    wa1_ref, ba1_ref, wa2_ref, ba2_ref,       # attn
    g2_ref, be2_ref,                          # ln2 over flat (NH*H)
    wfc_ref, bfc_ref,                         # fc (NH*H, Cp)
    o_ref,
    *, hidden_dim, num_heads, seq_len, tile_b,
):
    TB, S, H, NH = tile_b, seq_len, hidden_dim, num_heads

    # Fold the (TB, S) leading dims into the sublane axis (free regrouping:
    # trailing dim unchanged, S is the 8-row sublane tile).
    x = x_ref[...].reshape(TB * S, H)                                   # (TB*S, H)

    # TODO(synk): dropout_in / dropout_ff are identity (inference mode); no RNG dropout here.

    # pointwise_conv: Linear(H, 4H) -> GELU(exact) -> Linear(4H, H)
    # TODO(synk): bf16 operands here would ~2x MXU rate on v6e/v7x; gated on tolerance.
    h = jnp.dot(x, w1_ref[...], preferred_element_type=jnp.float32) + b1_ref[...]
    h = _gelu_exact(h)
    y = jnp.dot(h, w2_ref[...], preferred_element_type=jnp.float32) + b2_ref[...]

    # residual + LayerNorm(hidden_dim)
    xr = _layer_norm_lastdim(x + y, g1_ref[...], be1_ref[...])          # (TB*S, H)

    # additive attention scores: Linear(H, H) -> tanh -> Linear(H, NH)
    a = jnp.tanh(jnp.dot(xr, wa1_ref[...], preferred_element_type=jnp.float32) + ba1_ref[...])
    w = jnp.dot(a, wa2_ref[...], preferred_element_type=jnp.float32) + ba2_ref[...]   # (TB*S, NH)

    # mask bias ((TB,S,1), broadcast over heads on the lanes), scale, softmax over S
    w3 = (w.reshape(TB, S, NH) + bias_ref[0]) * (1.0 / math.sqrt(H))    # (TB, S, NH)
    w3 = w3 - jnp.max(w3, axis=1, keepdims=True)
    e = jnp.exp(w3)
    p = e / jnp.sum(e, axis=1, keepdims=True)                           # (TB, S, NH)

    # pooled_n[b, h] = sum_s p[b, s, n] * xr[b, s, h]
    # VPU broadcast-multiply + sublane reduce (static unroll over NH) — keeps
    # the MXU slot free instead of a batch of tiny K=S matmuls.
    xr3 = xr.reshape(TB, S, H)
    parts = [jnp.sum(p[:, :, n:n + 1] * xr3, axis=1) for n in range(NH)]   # NH x (TB, H)
    flat = jnp.concatenate(parts, axis=-1)                              # (TB, NH*H)

    # ln2: plain full-lane (NH*H = 128) last-dim LayerNorm
    normed = _layer_norm_lastdim(flat, g2_ref[...], be2_ref[...])       # (TB, NH*H)

    # fc: one (TB, NH*H) @ (NH*H, Cp) MXU matmul; lane-dense (TB, Cp) slab store.
    out = jnp.dot(normed, wfc_ref[...], preferred_element_type=jnp.float32) + bfc_ref[...]
    o_ref[...] = out[None, :, :]


def baseline_v2_forward(x, mask, params, *, target_rows=1024):
    B, S, H = x.shape
    NH = params["wa2"].shape[1]
    C = params["wfc"].shape[1]

    # --- batch tile selection -------------------------------------------------
    # Aim for ~target_rows folded rows per grid step (amortizes the ~0.35us/step
    # pipeline overhead), never pad by more than G-1 rows, and keep >=2 grid
    # steps whenever B >= 2 so the "parallel" axis shards across v7x's 2 TCs.
    TB0 = max(1, min(B, max(1, target_rows // S)))
    G = max(2 if B >= 2 else 1, _cdiv(B, TB0))
    TB = _cdiv(B, G)
    Bp = G * TB                                    # pad < TB rows (< G-1 of B)
    Cp = _cdiv(C, 128) * 128                       # lane-dense output slab

    x = x.astype(jnp.float32)
    xp = jnp.pad(x, ((0, Bp - B), (0, 0), (0, 0)))

    # Additive mask bias, NOT broadcast over heads (saves NH x HBM traffic);
    # padded rows get bias 0 (mask=1) and are sliced off below.
    bias = (1.0 - mask.astype(jnp.float32)) * -10000.0                  # (B, S)
    biasp = jnp.pad(bias, ((0, Bp - B), (0, 0))).reshape(G, TB, S, 1)

    wfc = params["wfc"]
    bfc = params["bfc"]
    if Cp != C:
        wfc = jnp.pad(wfc, ((0, 0), (0, Cp - C)))
        bfc = jnp.pad(bfc, ((0, 0), (0, Cp - C)))

    weight_args = (params["w1"], params["b1"], params["w2"], params["b2"],
                   params["g1"], params["be1"],
                   params["wa1"], params["ba1"], params["wa2"], params["ba2"],
                   params["g2"], params["be2"], wfc, bfc)

    def full_spec(a):
        # Whole-array block, constant index_map -> weights stay resident.
        # TODO(synk): if H is scaled up (>=1024), w1/w2 alone are ~64 MiB when
        # double-buffered and would exhaust v7x's 64 MiB VMEM: tile the 4H axis
        # (K grid axis + accumulator) and set vmem_limit_bytes explicitly.
        nd = a.ndim
        return pl.BlockSpec(a.shape, lambda b, _nd=nd: (0,) * _nd)

    kernel = functools.partial(baseline_v2_kernel, hidden_dim=H, num_heads=NH,
                               seq_len=S, tile_b=TB)

    rows = Bp * S
    flops = int(2 * rows * H * (4 * H)            # x @ w1
                + 2 * rows * (4 * H) * H          # h @ w2
                + 2 * rows * H * H                # xr @ wa1
                + 2 * rows * H * NH               # a @ wa2
                + 2 * Bp * S * NH * H             # pooling
                + 2 * Bp * (NH * H) * Cp)         # fc
    transcendentals = int(rows * (4 * H + H) + Bp * S * NH)
    bytes_accessed = int(4 * (xp.size + biasp.size + G * TB * Cp
                              + sum(a.size for a in weight_args)))

    out = pl.pallas_call(
        kernel,
        out_shape=jax.ShapeDtypeStruct((G, TB, Cp), jnp.float32),
        grid_spec=pltpu.PrefetchScalarGridSpec(
            num_scalar_prefetch=0,
            grid=(G,),
            in_specs=[pl.BlockSpec((TB, S, H), lambda b: (b, 0, 0)),
                      pl.BlockSpec((1, TB, S, 1), lambda b: (b, 0, 0, 0))]
                     + [full_spec(a) for a in weight_args],
            out_specs=pl.BlockSpec((1, TB, Cp), lambda b: (b, 0, 0)),
        ),
        compiler_params=pltpu.CompilerParams(dimension_semantics=("parallel",)),
        cost_estimate=pl.CostEstimate(flops=flops,
                                      transcendentals=transcendentals,
                                      bytes_accessed=bytes_accessed),
    )(xp, biasp, *weight_args)
    return out.reshape(Bp, Cp)[:B, :C]


def baseline_v2_reference(x, mask, params):
    # Pure-JAX reference mirroring the PyTorch forward (eval mode).
    B, S, H = x.shape
    NH = params["wa2"].shape[1]
    h = jax.nn.gelu(x @ params["w1"] + params["b1"], approximate=False)
    y = h @ params["w2"] + params["b2"]
    xr = x + y
    mu = xr.mean(-1, keepdims=True)
    var = jnp.square(xr - mu).mean(-1, keepdims=True)
    xr = (xr - mu) / jnp.sqrt(var + LN_EPS) * params["g1"] + params["be1"]
    a = jnp.tanh(xr @ params["wa1"] + params["ba1"])
    w = a @ params["wa2"] + params["ba2"]
    w = w + (1.0 - mask.astype(jnp.float32))[:, :, None] * -10000.0
    w = jax.nn.softmax(w / math.sqrt(H), axis=1)
    pooled = (xr[:, :, None, :] * w[:, :, :, None]).sum(1)      # (B, NH, H)
    flat = pooled.reshape(B, NH * H)
    mu = flat.mean(-1, keepdims=True)
    var = jnp.square(flat - mu).mean(-1, keepdims=True)
    flat = (flat - mu) / jnp.sqrt(var + LN_EPS) * params["g2"] + params["be2"]
    return flat @ params["wfc"] + params["bfc"]


def init_params(key, H, NH, C):
    ks = jax.random.split(key, 12)

    def w(k, shape, fan_in):
        return (jax.random.normal(k, shape) * (fan_in ** -0.5)).astype(jnp.float32)

    return dict(
        w1=w(ks[0], (H, 4 * H), H),        b1=w(ks[1], (1, 4 * H), 4 * H),
        w2=w(ks[2], (4 * H, H), 4 * H),    b2=w(ks[3], (1, H), H),
        g1=(1.0 + 0.1 * jax.random.normal(ks[4], (1, H))).astype(jnp.float32),
        be1=(0.1 * jax.random.normal(ks[5], (1, H))).astype(jnp.float32),
        wa1=w(ks[6], (H, H), H),           ba1=w(ks[7], (1, H), H),
        wa2=w(ks[8], (H, NH), H),          ba2=jnp.zeros((1, NH), jnp.float32),
        g2=(1.0 + 0.1 * jax.random.normal(ks[9], (1, NH * H))).astype(jnp.float32),
        be2=(0.1 * jax.random.normal(ks[10], (1, NH * H))).astype(jnp.float32),
        wfc=w(ks[11], (NH * H, C), NH * H),
        bfc=jnp.zeros((1, C), jnp.float32),
    )


if __name__ == "__main__":
    S, H, NH, C = 8, 32, 4, 16          # small shapes: hidden_dim=32, num_heads=4, num_classes=16
    key = jax.random.PRNGKey(0)
    k_x, k_p, k_m = jax.random.split(key, 3)
    params = init_params(k_p, H, NH, C)

    # Case 1: shipped small config (B=2): no batch padding, 2-step grid.
    B = 2
    x = (0.5 * jax.random.normal(k_x, (B, S, H))).astype(jnp.float32)
    mask = jnp.array([[1.0] * S,
                      [1.0] * (S - 3) + [0.0] * 3], dtype=jnp.float32)  # (B, S)
    out = jax.block_until_ready(baseline_v2_forward(x, mask, params))
    ref = baseline_v2_reference(x, mask, params)
    assert out.shape == (B, C)
    if not jnp.allclose(out, ref, rtol=1e-3, atol=1e-3):
        raise AssertionError(f"case1 mismatch: max abs err = {jnp.max(jnp.abs(out - ref))}")

    # Case 2: B=5 exercises a padded tail tile (TB=3, Bp=6) and a random mask.
    B2 = 5
    x2 = (0.5 * jax.random.normal(jax.random.fold_in(k_x, 1), (B2, S, H))).astype(jnp.float32)
    m2 = (jax.random.uniform(k_m, (B2, S)) > 0.4).astype(jnp.float32)
    m2 = m2.at[:, 0].set(1.0)       # keep at least one unmasked position per row
    out2 = jax.block_until_ready(baseline_v2_forward(x2, m2, params))
    ref2 = baseline_v2_reference(x2, m2, params)
    if not jnp.allclose(out2, ref2, rtol=1e-3, atol=1e-3):
        raise AssertionError(f"case2 mismatch: max abs err = {jnp.max(jnp.abs(out2 - ref2))}")

    print("KERNEL_OK")
</pallas_src>

<mosaic_0001>
module attributes {stable_mosaic.version = 11 : i64} {
  func.func @baseline_v2_kernel(%arg0: i32, %arg1: memref<1x8x32xf32, #tpu.memory_space<vmem>>, %arg2: memref<1x1x8x1xf32, #tpu.memory_space<vmem>>, %arg3: memref<32x128xf32, #tpu.memory_space<vmem>>, %arg4: memref<1x128xf32, #tpu.memory_space<vmem>>, %arg5: memref<128x32xf32, #tpu.memory_space<vmem>>, %arg6: memref<1x32xf32, #tpu.memory_space<vmem>>, %arg7: memref<1x32xf32, #tpu.memory_space<vmem>>, %arg8: memref<1x32xf32, #tpu.memory_space<vmem>>, %arg9: memref<32x32xf32, #tpu.memory_space<vmem>>, %arg10: memref<1x32xf32, #tpu.memory_space<vmem>>, %arg11: memref<32x4xf32, #tpu.memory_space<vmem>>, %arg12: memref<1x4xf32, #tpu.memory_space<vmem>>, %arg13: memref<1x128xf32, #tpu.memory_space<vmem>>, %arg14: memref<1x128xf32, #tpu.memory_space<vmem>>, %arg15: memref<128x128xf32, #tpu.memory_space<vmem>>, %arg16: memref<1x128xf32, #tpu.memory_space<vmem>>, %arg17: memref<1x1x128xf32, #tpu.memory_space<vmem>>) attributes {dimension_semantics = [#tpu.dimension_semantics<parallel>], iteration_bounds = array<i64: 2>, scalar_prefetch = 0 : i64, scratch_operands = 0 : i64, tpu.core_type = #tpu.core_type<tc>, window_params = [{transform_indices = @transform_0, window_bounds = array<i64: 1, 8, 32>}, {transform_indices = @transform_1, window_bounds = array<i64: 1, 1, 8, 1>}, {pipeline_mode = #tpu.pipeline_mode<synchronous>, transform_indices = @transform_2, window_bounds = array<i64: 32, 128>}, {pipeline_mode = #tpu.pipeline_mode<synchronous>, transform_indices = @transform_3, window_bounds = array<i64: 1, 128>}, {pipeline_mode = #tpu.pipeline_mode<synchronous>, transform_indices = @transform_4, window_bounds = array<i64: 128, 32>}, {pipeline_mode = #tpu.pipeline_mode<synchronous>, transform_indices = @transform_5, window_bounds = array<i64: 1, 32>}, {pipeline_mode = #tpu.pipeline_mode<synchronous>, transform_indices = @transform_6, window_bounds = array<i64: 1, 32>}, {pipeline_mode = #tpu.pipeline_mode<synchronous>, transform_indices = @transform_7, window_bounds = array<i64: 1, 32>}, {pipeline_mode = #tpu.pipeline_mode<synchronous>, transform_indices = @transform_8, window_bounds = array<i64: 32, 32>}, {pipeline_mode = #tpu.pipeline_mode<synchronous>, transform_indices = @transform_9, window_bounds = array<i64: 1, 32>}, {pipeline_mode = #tpu.pipeline_mode<synchronous>, transform_indices = @transform_10, window_bounds = array<i64: 32, 4>}, {pipeline_mode = #tpu.pipeline_mode<synchronous>, transform_indices = @transform_11, window_bounds = array<i64: 1, 4>}, {pipeline_mode = #tpu.pipeline_mode<synchronous>, transform_indices = @transform_12, window_bounds = array<i64: 1, 128>}, {pipeline_mode = #tpu.pipeline_mode<synchronous>, transform_indices = @transform_13, window_bounds = array<i64: 1, 128>}, {pipeline_mode = #tpu.pipeline_mode<synchronous>, transform_indices = @transform_14, window_bounds = array<i64: 128, 128>}, {pipeline_mode = #tpu.pipeline_mode<synchronous>, transform_indices = @transform_15, window_bounds = array<i64: 1, 128>}, {transform_indices = @transform_16, window_bounds = array<i64: 1, 1, 128>}]} {
    %c0 = arith.constant 0 : index
    %c0_0 = arith.constant 0 : index
    %c0_1 = arith.constant 0 : index
    %0 = vector.load %arg1[%c0, %c0_0, %c0_1] : memref<1x8x32xf32, #tpu.memory_space<vmem>>, vector<1x8x32xf32>
    %1 = vector.shape_cast %0 : vector<1x8x32xf32> to vector<8x32xf32>
    %c0_2 = arith.constant 0 : index
    %c0_3 = arith.constant 0 : index
    %2 = vector.load %arg3[%c0_2, %c0_3] : memref<32x128xf32, #tpu.memory_space<vmem>>, vector<32x128xf32>
    %cst = arith.constant dense<0.000000e+00> : vector<8x128xf32>
    %3 = tpu.matmul %1, %2, %cst {dimension_numbers = #tpu.dot_dimension_numbers<[1], [0], [0], [1], [0, 0, 1, 1], [], []>} : vector<8x32xf32>, vector<32x128xf32>, vector<8x128xf32> -> vector<8x128xf32>
    %c0_4 = arith.constant 0 : index
    %c0_5 = arith.constant 0 : index
    %4 = vector.load %arg4[%c0_4, %c0_5] : memref<1x128xf32, #tpu.memory_space<vmem>>, vector<1x128xf32>
    %5 = vector.broadcast %4 : vector<1x128xf32> to vector<8x128xf32>
    %6 = arith.addf %3, %5 : vector<8x128xf32>
    %cst_6 = arith.constant 5.000000e-01 : f32
    %7 = vector.broadcast %cst_6 : f32 to vector<8x128xf32>
    %8 = arith.mulf %7, %6 : vector<8x128xf32>
    %cst_7 = arith.constant 0.707106769 : f32
    %9 = vector.broadcast %cst_7 : f32 to vector<8x128xf32>
    %10 = arith.mulf %6, %9 : vector<8x128xf32>
    %cst_8 = arith.constant 0.000000e+00 : f32
    %11 = vector.broadcast %cst_8 : f32 to vector<8x128xf32>
    %12 = arith.cmpf oge, %10, %11 : vector<8x128xf32>
    %cst_9 = arith.constant 1.000000e+00 : f32
    %cst_10 = arith.constant -1.000000e+00 : f32
    %13 = vector.broadcast %cst_9 : f32 to vector<8x128xf32>
    %14 = vector.broadcast %cst_10 : f32 to vector<8x128xf32>
    %15 = arith.select %12, %13, %14 : vector<8x128xi1>, vector<8x128xf32>
    %16 = math.absf %10 : vector<8x128xf32>
    %cst_11 = arith.constant 0.327591091 : f32
    %17 = vector.broadcast %cst_11 : f32 to vector<8x128xf32>
    %18 = arith.mulf %17, %16 : vector<8x128xf32>
    %cst_12 = arith.constant 1.000000e+00 : f32
    %19 = vector.broadcast %cst_12 : f32 to vector<8x128xf32>
    %20 = arith.addf %19, %18 : vector<8x128xf32>
    %cst_13 = arith.constant 1.000000e+00 : f32
    %21 = vector.broadcast %cst_13 : f32 to vector<8x128xf32>
    %22 = arith.divf %21, %20 : vector<8x128xf32>
    %cst_14 = arith.constant 1.06140542 : f32
    %23 = vector.broadcast %cst_14 : f32 to vector<8x128xf32>
    %24 = arith.mulf %23, %22 : vector<8x128xf32>
    %cst_15 = arith.constant -1.45315206 : f32
    %25 = vector.broadcast %cst_15 : f32 to vector<8x128xf32>
    %26 = arith.addf %24, %25 : vector<8x128xf32>
    %27 = arith.mulf %26, %22 : vector<8x128xf32>
    %cst_16 = arith.constant 1.42141378 : f32
    %28 = vector.broadcast %cst_16 : f32 to vector<8x128xf32>
    %29 = arith.addf %27, %28 : vector<8x128xf32>
    %30 = arith.mulf %29, %22 : vector<8x128xf32>
    %cst_17 = arith.constant -0.284496725 : f32
    %31 = vector.broadcast %cst_17 : f32 to vector<8x128xf32>
    %32 = arith.addf %30, %31 : vector<8x128xf32>
    %33 = arith.mulf %32, %22 : vector<8x128xf32>
    %cst_18 = arith.constant 0.254829586 : f32
    %34 = vector.broadcast %cst_18 : f32 to vector<8x128xf32>
    %35 = arith.addf %33, %34 : vector<8x128xf32>
    %36 = arith.mulf %35, %22 : vector<8x128xf32>
    %cst_19 = arith.constant 0.000000e+00 : f32
    %37 = vector.broadcast %cst_19 : f32 to vector<8x128xf32>
    %38 = arith.subf %37, %16 : vector<8x128xf32>
    %39 = arith.mulf %38, %16 : vector<8x128xf32>
    %40 = math.exp %39 : vector<8x128xf32>
    %41 = arith.mulf %36, %40 : vector<8x128xf32>
    %cst_20 = arith.constant 1.000000e+00 : f32
    %42 = vector.broadcast %cst_20 : f32 to vector<8x128xf32>
    %43 = arith.subf %42, %41 : vector<8x128xf32>
    %44 = arith.mulf %15, %43 : vector<8x128xf32>
    %cst_21 = arith.constant 1.000000e+00 : f32
    %45 = vector.broadcast %cst_21 : f32 to vector<8x128xf32>
    %46 = arith.addf %45, %44 : vector<8x128xf32>
    %47 = arith.mulf %8, %46 : vector<8x128xf32>
    %c0_22 = arith.constant 0 : index
    %c0_23 = arith.constant 0 : index
    %48 = vector.load %arg5[%c0_22, %c0_23] : memref<128x32xf32, #tpu.memory_space<vmem>>, vector<128x32xf32>
    %cst_24 = arith.constant dense<0.000000e+00> : vector<8x32xf32>
    %49 = tpu.matmul %47, %48, %cst_24 {dimension_numbers = #tpu.dot_dimension_numbers<[1], [0], [0], [1], [0, 0, 1, 1], [], []>} : vector<8x128xf32>, vector<128x32xf32>, vector<8x32xf32> -> vector<8x32xf32>
    %c0_25 = arith.constant 0 : index
    %c0_26 = arith.constant 0 : index
    %50 = vector.load %arg6[%c0_25, %c0_26] : memref<1x32xf32, #tpu.memory_space<vmem>>, vector<1x32xf32>
    %51 = vector.broadcast %50 : vector<1x32xf32> to vector<8x32xf32>
    %52 = arith.addf %49, %51 : vector<8x32xf32>
    %53 = arith.addf %1, %52 : vector<8x32xf32>
    %c0_27 = arith.constant 0 : index
    %c0_28 = arith.constant 0 : index
    %54 = vector.load %arg7[%c0_27, %c0_28] : memref<1x32xf32, #tpu.memory_space<vmem>>, vector<1x32xf32>
    %c0_29 = arith.constant 0 : index
    %c0_30 = arith.constant 0 : index
    %55 = vector.load %arg8[%c0_29, %c0_30] : memref<1x32xf32, #tpu.memory_space<vmem>>, vector<1x32xf32>
    %cst_31 = arith.constant dense<0.000000e+00> : vector<8xf32>
    %56 = vector.multi_reduction <add>, %53, %cst_31 [1] : vector<8x32xf32> to vector<8xf32>
    %57 = vector.shape_cast %56 : vector<8xf32> to vector<8x1xf32>
    %cst_32 = arith.constant 3.200000e+01 : f32
    %58 = vector.broadcast %cst_32 : f32 to vector<8x1xf32>
    %59 = arith.divf %57, %58 : vector<8x1xf32>
    %60 = vector.broadcast %59 : vector<8x1xf32> to vector<8x32xf32>
    %61 = arith.subf %53, %60 : vector<8x32xf32>
    %62 = arith.mulf %61, %61 : vector<8x32xf32>
    %cst_33 = arith.constant dense<0.000000e+00> : vector<8xf32>
    %63 = vector.multi_reduction <add>, %62, %cst_33 [1] : vector<8x32xf32> to vector<8xf32>
    %64 = vector.shape_cast %63 : vector<8xf32> to vector<8x1xf32>
    %cst_34 = arith.constant 3.200000e+01 : f32
    %65 = vector.broadcast %cst_34 : f32 to vector<8x1xf32>
    %66 = arith.divf %64, %65 : vector<8x1xf32>
    %67 = vector.broadcast %59 : vector<8x1xf32> to vector<8x32xf32>
    %68 = arith.subf %53, %67 : vector<8x32xf32>
    %cst_35 = arith.constant 9.99999974E-6 : f32
    %69 = vector.broadcast %cst_35 : f32 to vector<8x1xf32>
    %70 = arith.addf %66, %69 : vector<8x1xf32>
    %71 = math.rsqrt %70 : vector<8x1xf32>
    %72 = vector.broadcast %71 : vector<8x1xf32> to vector<8x32xf32>
    %73 = arith.mulf %68, %72 : vector<8x32xf32>
    %74 = vector.broadcast %54 : vector<1x32xf32> to vector<8x32xf32>
    %75 = arith.mulf %73, %74 : vector<8x32xf32>
    %76 = vector.broadcast %55 : vector<1x32xf32> to vector<8x32xf32>
    %77 = arith.addf %75, %76 : vector<8x32xf32>
    %c0_36 = arith.constant 0 : index
    %c0_37 = arith.constant 0 : index
    %78 = vector.load %arg9[%c0_36, %c0_37] : memref<32x32xf32, #tpu.memory_space<vmem>>, vector<32x32xf32>
    %cst_38 = arith.constant dense<0.000000e+00> : vector<8x32xf32>
    %79 = tpu.matmul %77, %78, %cst_38 {dimension_numbers = #tpu.dot_dimension_numbers<[1], [0], [0], [1], [0, 0, 1, 1], [], []>} : vector<8x32xf32>, vector<32x32xf32>, vector<8x32xf32> -> vector<8x32xf32>
    %c0_39 = arith.constant 0 : index
    %c0_40 = arith.constant 0 : index
    %80 = vector.load %arg10[%c0_39, %c0_40] : memref<1x32xf32, #tpu.memory_space<vmem>>, vector<1x32xf32>
    %81 = vector.broadcast %80 : vector<1x32xf32> to vector<8x32xf32>
    %82 = arith.addf %79, %81 : vector<8x32xf32>
    %83 = math.tanh %82 : vector<8x32xf32>
    %c0_41 = arith.constant 0 : index
    %c0_42 = arith.constant 0 : index
    %84 = vector.load %arg11[%c0_41, %c0_42] : memref<32x4xf32, #tpu.memory_space<vmem>>, vector<32x4xf32>
    %cst_43 = arith.constant dense<0.000000e+00> : vector<8x4xf32>
    %85 = tpu.matmul %83, %84, %cst_43 {dimension_numbers = #tpu.dot_dimension_numbers<[1], [0], [0], [1], [0, 0, 1, 1], [], []>} : vector<8x32xf32>, vector<32x4xf32>, vector<8x4xf32> -> vector<8x4xf32>
    %c0_44 = arith.constant 0 : index
    %c0_45 = arith.constant 0 : index
    %86 = vector.load %arg12[%c0_44, %c0_45] : memref<1x4xf32, #tpu.memory_space<vmem>>, vector<1x4xf32>
    %87 = vector.broadcast %86 : vector<1x4xf32> to vector<8x4xf32>
    %88 = arith.addf %85, %87 : vector<8x4xf32>
    %89 = vector.shape_cast %88 : vector<8x4xf32> to vector<1x8x4xf32>
    %c0_46 = arith.constant 0 : index
    %c0_47 = arith.constant 0 : index
    %c0_48 = arith.constant 0 : index
    %c0_49 = arith.constant 0 : index
    %90 = vector.load %arg2[%c0_46, %c0_47, %c0_48, %c0_49] : memref<1x1x8x1xf32, #tpu.memory_space<vmem>>, vector<1x1x8x1xf32>
    %91 = vector.shape_cast %90 : vector<1x1x8x1xf32> to vector<1x8x1xf32>
    %92 = vector.broadcast %91 : vector<1x8x1xf32> to vector<1x8x4xf32>
    %93 = arith.addf %89, %92 : vector<1x8x4xf32>
    %cst_50 = arith.constant 0.176776692 : f32
    %94 = vector.broadcast %cst_50 : f32 to vector<1x8x4xf32>
    %95 = arith.mulf %93, %94 : vector<1x8x4xf32>
    %cst_51 = arith.constant dense<0xFF800000> : vector<1x4xf32>
    %96 = vector.multi_reduction <maximumf>, %95, %cst_51 [1] : vector<1x8x4xf32> to vector<1x4xf32>
    %97 = vector.shape_cast %96 : vector<1x4xf32> to vector<1x1x4xf32>
    %98 = vector.broadcast %97 : vector<1x1x4xf32> to vector<1x8x4xf32>
    %99 = arith.subf %95, %98 : vector<1x8x4xf32>
    %100 = math.exp %99 : vector<1x8x4xf32>
    %cst_52 = arith.constant dense<0.000000e+00> : vector<1x4xf32>
    %101 = vector.multi_reduction <add>, %100, %cst_52 [1] : vector<1x8x4xf32> to vector<1x4xf32>
    %102 = vector.shape_cast %101 : vector<1x4xf32> to vector<1x1x4xf32>
    %103 = vector.broadcast %102 : vector<1x1x4xf32> to vector<1x8x4xf32>
    %104 = arith.divf %100, %103 : vector<1x8x4xf32>
    %105 = vector.shape_cast %77 : vector<8x32xf32> to vector<1x8x32xf32>
    %106 = vector.extract_strided_slice %104 {offsets = [0, 0, 0], sizes = [1, 8, 1], strides = [1, 1, 1]} : vector<1x8x4xf32> to vector<1x8x1xf32>
    %107 = vector.broadcast %106 : vector<1x8x1xf32> to vector<1x8x32xf32>
    %108 = arith.mulf %107, %105 : vector<1x8x32xf32>
    %cst_53 = arith.constant dense<0.000000e+00> : vector<1x32xf32>
    %109 = vector.multi_reduction <add>, %108, %cst_53 [1] : vector<1x8x32xf32> to vector<1x32xf32>
    %110 = vector.extract_strided_slice %104 {offsets = [0, 0, 1], sizes = [1, 8, 1], strides = [1, 1, 1]} : vector<1x8x4xf32> to vector<1x8x1xf32>
    %111 = vector.broadcast %110 : vector<1x8x1xf32> to vector<1x8x32xf32>
    %112 = arith.mulf %111, %105 : vector<1x8x32xf32>
    %cst_54 = arith.constant dense<0.000000e+00> : vector<1x32xf32>
    %113 = vector.multi_reduction <add>, %112, %cst_54 [1] : vector<1x8x32xf32> to vector<1x32xf32>
    %114 = vector.extract_strided_slice %104 {offsets = [0, 0, 2], sizes = [1, 8, 1], strides = [1, 1, 1]} : vector<1x8x4xf32> to vector<1x8x1xf32>
    %115 = vector.broadcast %114 : vector<1x8x1xf32> to vector<1x8x32xf32>
    %116 = arith.mulf %115, %105 : vector<1x8x32xf32>
    %cst_55 = arith.constant dense<0.000000e+00> : vector<1x32xf32>
    %117 = vector.multi_reduction <add>, %116, %cst_55 [1] : vector<1x8x32xf32> to vector<1x32xf32>
    %118 = vector.extract_strided_slice %104 {offsets = [0, 0, 3], sizes = [1, 8, 1], strides = [1, 1, 1]} : vector<1x8x4xf32> to vector<1x8x1xf32>
    %119 = vector.broadcast %118 : vector<1x8x1xf32> to vector<1x8x32xf32>
    %120 = arith.mulf %119, %105 : vector<1x8x32xf32>
    %cst_56 = arith.constant dense<0.000000e+00> : vector<1x32xf32>
    %121 = vector.multi_reduction <add>, %120, %cst_56 [1] : vector<1x8x32xf32> to vector<1x32xf32>
    %122 = tpu.concatenate %109, %113, %117, %121 in 1 : vector<1x32xf32>, vector<1x32xf32>, vector<1x32xf32>, vector<1x32xf32> -> vector<1x128xf32>
    %c0_57 = arith.constant 0 : index
    %c0_58 = arith.constant 0 : index
    %123 = vector.load %arg13[%c0_57, %c0_58] : memref<1x128xf32, #tpu.memory_space<vmem>>, vector<1x128xf32>
    %c0_59 = arith.constant 0 : index
    %c0_60 = arith.constant 0 : index
    %124 = vector.load %arg14[%c0_59, %c0_60] : memref<1x128xf32, #tpu.memory_space<vmem>>, vector<1x128xf32>
    %cst_61 = arith.constant dense<0.000000e+00> : vector<1xf32>
    %125 = vector.multi_reduction <add>, %122, %cst_61 [1] : vector<1x128xf32> to vector<1xf32>
    %126 = vector.shape_cast %125 : vector<1xf32> to vector<1x1xf32>
    %cst_62 = arith.constant 1.280000e+02 : f32
    %127 = vector.broadcast %cst_62 : f32 to vector<1x1xf32>
    %128 = arith.divf %126, %127 : vector<1x1xf32>
    %129 = vector.broadcast %128 : vector<1x1xf32> to vector<1x128xf32>
    %130 = arith.subf %122, %129 : vector<1x128xf32>
    %131 = arith.mulf %130, %130 : vector<1x128xf32>
    %cst_63 = arith.constant dense<0.000000e+00> : vector<1xf32>
    %132 = vector.multi_reduction <add>, %131, %cst_63 [1] : vector<1x128xf32> to vector<1xf32>
    %133 = vector.shape_cast %132 : vector<1xf32> to vector<1x1xf32>
    %cst_64 = arith.constant 1.280000e+02 : f32
    %134 = vector.broadcast %cst_64 : f32 to vector<1x1xf32>
    %135 = arith.divf %133, %134 : vector<1x1xf32>
    %136 = vector.broadcast %128 : vector<1x1xf32> to vector<1x128xf32>
    %137 = arith.subf %122, %136 : vector<1x128xf32>
    %cst_65 = arith.constant 9.99999974E-6 : f32
    %138 = vector.broadcast %cst_65 : f32 to vector<1x1xf32>
    %139 = arith.addf %135, %138 : vector<1x1xf32>
    %140 = math.rsqrt %139 : vector<1x1xf32>
    %141 = vector.broadcast %140 : vector<1x1xf32> to vector<1x128xf32>
    %142 = arith.mulf %137, %141 : vector<1x128xf32>
    %143 = arith.mulf %142, %123 : vector<1x128xf32>
    %144 = arith.addf %143, %124 : vector<1x128xf32>
    %c0_66 = arith.constant 0 : index
    %c0_67 = arith.constant 0 : index
    %145 = vector.load %arg15[%c0_66, %c0_67] : memref<128x128xf32, #tpu.memory_space<vmem>>, vector<128x128xf32>
    %cst_68 = arith.constant dense<0.000000e+00> : vector<1x128xf32>
    %146 = tpu.matmul %144, %145, %cst_68 {dimension_numbers = #tpu.dot_dimension_numbers<[1], [0], [0], [1], [0, 0, 1, 1], [], []>} : vector<1x128xf32>, vector<128x128xf32>, vector<1x128xf32> -> vector<1x128xf32>
    %c0_69 = arith.constant 0 : index
    %c0_70 = arith.constant 0 : index
    %147 = vector.load %arg16[%c0_69, %c0_70] : memref<1x128xf32, #tpu.memory_space<vmem>>, vector<1x128xf32>
    %148 = arith.addf %146, %147 : vector<1x128xf32>
    %149 = vector.shape_cast %148 : vector<1x128xf32> to vector<1x1x128xf32>
    %c0_71 = arith.constant 0 : index
    %c0_72 = arith.constant 0 : index
    %c0_73 = arith.constant 0 : index
    %150 = vector.load %arg17[%c0_71, %c0_72, %c0_73] : memref<1x1x128xf32, #tpu.memory_space<vmem>>, vector<1x1x128xf32>
    tpu.vector_store %arg17[%c0_71, %c0_72, %c0_73], %149 {strides = array<i32>} : memref<1x1x128xf32, #tpu.memory_space<vmem>>, vector<1x1x128xf32>,
    return
  }
  func.func @transform_0(%arg0: i32) -> (i32, i32, i32) {
    %c0_i32 = arith.constant 0 : i32
    %c0_i32_0 = arith.constant 0 : i32
    %c0_i32_1 = arith.constant 0 : i32
    return %arg0, %c0_i32, %c0_i32_0 : i32, i32, i32
  }
  func.func @transform_1(%arg0: i32) -> (i32, i32, i32, i32) {
    %c0_i32 = arith.constant 0 : i32
    %c0_i32_0 = arith.constant 0 : i32
    %c0_i32_1 = arith.constant 0 : i32
    %c0_i32_2 = arith.constant 0 : i32
    return %arg0, %c0_i32, %c0_i32_0, %c0_i32_1 : i32, i32, i32, i32
  }
  func.func @transform_2(%arg0: i32) -> (i32, i32) {
    %c0_i32 = arith.constant 0 : i32
    %c0_i32_0 = arith.constant 0 : i32
    %c0_i32_1 = arith.constant 0 : i32
    return %c0_i32, %c0_i32_0 : i32, i32
  }
  func.func @transform_3(%arg0: i32) -> (i32, i32) {
    %c0_i32 = arith.constant 0 : i32
    %c0_i32_0 = arith.constant 0 : i32
    %c0_i32_1 = arith.constant 0 : i32
    return %c0_i32, %c0_i32_0 : i32, i32
  }
  func.func @transform_4(%arg0: i32) -> (i32, i32) {
    %c0_i32 = arith.constant 0 : i32
    %c0_i32_0 = arith.constant 0 : i32
    %c0_i32_1 = arith.constant 0 : i32
    return %c0_i32, %c0_i32_0 : i32, i32
  }
  func.func @transform_5(%arg0: i32) -> (i32, i32) {
    %c0_i32 = arith.constant 0 : i32
    %c0_i32_0 = arith.constant 0 : i32
    %c0_i32_1 = arith.constant 0 : i32
    return %c0_i32, %c0_i32_0 : i32, i32
  }
  func.func @transform_6(%arg0: i32) -> (i32, i32) {
    %c0_i32 = arith.constant 0 : i32
    %c0_i32_0 = arith.constant 0 : i32
    %c0_i32_1 = arith.constant 0 : i32
    return %c0_i32, %c0_i32_0 : i32, i32
  }
  func.func @transform_7(%arg0: i32) -> (i32, i32) {
    %c0_i32 = arith.constant 0 : i32
    %c0_i32_0 = arith.constant 0 : i32
    %c0_i32_1 = arith.constant 0 : i32
    return %c0_i32, %c0_i32_0 : i32, i32
  }
  func.func @transform_8(%arg0: i32) -> (i32, i32) {
    %c0_i32 = arith.constant 0 : i32
    %c0_i32_0 = arith.constant 0 : i32
    %c0_i32_1 = arith.constant 0 : i32
    return %c0_i32, %c0_i32_0 : i32, i32
  }
  func.func @transform_9(%arg0: i32) -> (i32, i32) {
    %c0_i32 = arith.constant 0 : i32
    %c0_i32_0 = arith.constant 0 : i32
    %c0_i32_1 = arith.constant 0 : i32
    return %c0_i32, %c0_i32_0 : i32, i32
  }
  func.func @transform_10(%arg0: i32) -> (i32, i32) {
    %c0_i32 = arith.constant 0 : i32
    %c0_i32_0 = arith.constant 0 : i32
    %c0_i32_1 = arith.constant 0 : i32
    return %c0_i32, %c0_i32_0 : i32, i32
  }
  func.func @transform_11(%arg0: i32) -> (i32, i32) {
    %c0_i32 = arith.constant 0 : i32
    %c0_i32_0 = arith.constant 0 : i32
    %c0_i32_1 = arith.constant 0 : i32
    return %c0_i32, %c0_i32_0 : i32, i32
  }
  func.func @transform_12(%arg0: i32) -> (i32, i32) {
    %c0_i32 = arith.constant 0 : i32
    %c0_i32_0 = arith.constant 0 : i32
    %c0_i32_1 = arith.constant 0 : i32
    return %c0_i32, %c0_i32_0 : i32, i32
  }
  func.func @transform_13(%arg0: i32) -> (i32, i32) {
    %c0_i32 = arith.constant 0 : i32
    %c0_i32_0 = arith.constant 0 : i32
    %c0_i32_1 = arith.constant 0 : i32
    return %c0_i32, %c0_i32_0 : i32, i32
  }
  func.func @transform_14(%arg0: i32) -> (i32, i32) {
    %c0_i32 = arith.constant 0 : i32
    %c0_i32_0 = arith.constant 0 : i32
    %c0_i32_1 = arith.constant 0 : i32
    return %c0_i32, %c0_i32_0 : i32, i32
  }
  func.func @transform_15(%arg0: i32) -> (i32, i32) {
    %c0_i32 = arith.constant 0 : i32
    %c0_i32_0 = arith.constant 0 : i32
    %c0_i32_1 = arith.constant 0 : i32
    return %c0_i32, %c0_i32_0 : i32, i32
  }
  func.func @transform_16(%arg0: i32) -> (i32, i32, i32) {
    %c0_i32 = arith.constant 0 : i32
    %c0_i32_0 = arith.constant 0 : i32
    %c0_i32_1 = arith.constant 0 : i32
    return %arg0, %c0_i32, %c0_i32_0 : i32, i32, i32
  }
}

</mosaic_0001>

<bundles_post_ra>
// kernel: tpu_custom_call.1
= control target key start
LH: loop header
LB: loop body
LE: loop exit
PB: predicated region body
PF: predicated region fallthrough
CT: control target
= control target key end

     0   :  { %s1536_s0 = inlined_call_operand.vmem [shape: f32[2,8,32], index: 0, kind: input, shape index: {}]   ;;  %s1537_s1 = inlined_call_operand.vmem [shape: f32[2,1,8,1], index: 1, kind: input, shape index: {}]   ;;  %s1538_s2 = inlined_call_operand.vmem [shape: f32[32,128], index: 2, kind: input, shape index: {}]   ;;  %s1539_s3 = inlined_call_operand.vmem [shape: f32[1,128], index: 3, kind: input, shape index: {}]   ;;  %s1540_s4 = inlined_call_operand.vmem [shape: f32[128,32], index: 4, kind: input, shape index: {}]   ;;  %s1541_s5 = inlined_call_operand.vmem [shape: f32[1,32], index: 5, kind: input, shape index: {}]   ;;  %s1542_s6 = inlined_call_operand.vmem [shape: f32[1,32], index: 6, kind: input, shape index: {}]   ;;  %s1543_s7 = inlined_call_operand.vmem [shape: f32[1,32], index: 7, kind: input, shape index: {}]   ;;  %s1544_s8 = inlined_call_operand.vmem [shape: f32[32,32], index: 8, kind: input, shape index: {}]   ;;  %s1545_s9 = inlined_call_operand.vmem [shape: f32[1,32], index: 9, kind: input, shape index: {}]   ;;  %s1546_s10 = inlined_call_operand.vmem [shape: f32[32,4], index: 10, kind: input, shape index: {}]   ;;  %s1547_s11 = inlined_call_operand.vmem [shape: f32[1,4], index: 11, kind: input, shape index: {}]   ;;  %s1548_s12 = inlined_call_operand.vmem [shape: f32[1,128], index: 12, kind: input, shape index: {}]   ;;  %s1549_s13 = inlined_call_operand.vmem [shape: f32[1,128], index: 13, kind: input, shape index: {}]   ;;  %s1550_s14 = inlined_call_operand.vmem [shape: f32[128,128], index: 14, kind: input, shape index: {}]   ;;  %s1551_s15 = inlined_call_operand.vmem [shape: f32[1,128], index: 15, kind: input, shape index: {}]   ;;  %s1552_s16 = inlined_call_operand.hbm [shape: f32[2,1,128], index: 16, kind: output, shape index: {}]  }
   0x1   :  { %1558 = sst [smem:[#allocation10_spill]] %s1536_s0 }
   0x2   :  { %1559 = sst [smem:[#allocation11_spill]] %s1538_s2 }
   0x3   :  { %21 = vsyncpa [#allocation3], 0 }
   0x4   :  { %23 = vsyncpa [#allocation3 + $0x1], 0  ;;  %s1257_s21 = smov 0   ;;  %s1259_s22 = smov 0  }
   0x5   :  { %s1261_s23 = smov 0   ;;  %s1263_s24 = smov 0  }
   0x6 LB: > { %1560 = sst [smem:[#allocation5_spill]] %s1148_s21  ;;  %s1278_s25 = sadd.s32 4294967295, %s1160_s24   ;;  %s1160_s24 = sphi %s1263_s24, %s1571_s24   ;;  %s1156_s23 = sphi %s1261_s23, %s1576_s23   ;;  %s1152_s22 = sphi %s1259_s22, %s1575_s22   ;;  %s1148_s21 = sphi %s1257_s21, %s1574_s21  }
   0x7   : > { %1561 = sst [smem:[#allocation6_spill]] %s1156_s23  ;;  %s1008_s26 = sadd.s32 4294967294, %s1160_s24  }
   0x8   : > { %s1282_s27 = sadd.s32 1, %s1160_s24   ;;  %s382_s28 = sadd.s32 1, %s1156_s23 }
   0x9   : > { %1562 = sst [smem:[#allocation7_spill]] %s1282_s27  ;;  %s379_s29 = ssub.s32 %s1160_s24, %s1282_s27 }
   0xa   : > { %p392_p0 = scmp.ne.s32.totalorder %s1156_s23, %s1152_s22  ;;  %p380_p1 = scmp.eq.s32.totalorder %s379_s29, 0 }
   0xb   : > { %p393_p2 = scmp.eq.s32.totalorder %s1278_s25, 1  ;;  %p398_p3 = scmp.ne.s32.totalorder %s1152_s22, %s1148_s21 }
   0xc   : > { %p399_p4 = scmp.eq.s32.totalorder %s1008_s26, 1  ;;  %p1011_p7 = scmp.ge.s32.totalorder %s1160_s24, 1 }
   0xd   : > { %s1293_s30 = scalar_select %p380_p1, %s1156_s23, %s382_s28  }
   0xe   : > { %p1295_p5 = por %p393_p2, %p392_p0  ;;  %p1299_p6 = por %p399_p4, %p398_p3 }
   0xf   : > { %1563 = sst [smem:[#allocation8_spill]] %s1293_s30  ;;  %p473_p8 = scmp.lt.s32.totalorder %s1160_s24, 3 }
  0x10   : > { %s1565_s17 = scalar_select %p1299_p6, 1, 0 }
  0x11   : > { %p474_p9 = pnand %p1011_p7, %p473_p8 }
  0x12   : > { %1566 = sst [smem:[#allocation9_spill]] %s1565_s17  ;;  %p525_p10 = scmp.lt.s32.totalorder (!%p474_p9), %s1278_s25, 1 }
  0x13   : > { %477 = sbr.rel (%p474_p9) target bundleno = 1607 (0x647), region = 84  ;;  %s1567_s2 = sld [smem:[#allocation11_spill]] (!%p474_p9) }
  0x14   : > { %s1568_s27 = sld [smem:[#allocation10_spill]] (!%p474_p9)  ;;  %s1169_s23 = smov (!%p474_p9), 32  }
  0x15   : > { %s1170_s18 = smov (!%p474_p9), 96  }
  0x18   : > { %s1316_s30 = scalar_select %p525_p10, %s1278_s25, 1  ;;  %vm542_vm0 = vcmask 261120   ;;  %v621_v5 = vld [vmem:[%s1540_s4 + $0x78] sm:$0xff]  ;;  %v620_v6 = vld [vmem:[%s1540_s4 + $0x70] sm:$0xff]  ;;  %v619_v7 = vld [vmem:[%s1540_s4 + $0x68] sm:$0xff]  ;;  %v1162_v53 = vmov -1.0  }
  0x19   : > { %v537_v0 = vld [vmem:[%s1567_s2 + $0x18] sm:$0xff]  ;;  %v536_v1 = vld [vmem:[%s1567_s2 + $0x10] sm:$0xff]  ;;  %v535_v2 = vld [vmem:[%s1567_s2 + $0x8] sm:$0xff]  ;;  %626 = vmatpush.msra.mxu1 %v621_v5  ;;  %vm757_vm10 = vcmask 31744   ;;  %vm852_vm15 = vcmask 523264  }
  0x1a   : > { %558 = vmatpush.msra.mxu2 %v537_v0  ;;  %v534_v3 = vld [vmem:[%s1567_s2] sm:$0xff]  ;;  %s1012_s19 = sshll.u32 %s1316_s30, 3  ;;  %v617_v9 = vld [vmem:[%s1540_s4 + $0x58] sm:$0xff]  ;;  %v616_v10 = vld [vmem:[%s1540_s4 + $0x50] sm:$0xff]  ;;  %v1163_v0 = vmov 32.0   ;;  %s523_s2 = sand.u32 1, %s1152_s22  }
  0x1b   : > { %s528_s17 = scalar_lea.vmem %s1568_s27, %s1012_s19  ;;  %627 = vmatpush.msra.mxu1 %v620_v6  ;;  %v618_v8 = vld [vmem:[%s1540_s4 + $0x60] sm:$0xff]  ;;  %v615_v12 = vld [vmem:[%s1540_s4 + $0x48] sm:$0xff]  ;;  %v613_v16 = vld [vmem:[%s1540_s4 + $0x38] sm:$0xff]  ;;  %s532_s20 = scalar_lea.vmem %s1537_s1, %s1012_s19 }
  0x1c   : > { %559 = vmatpush.msra.mxu2 %v536_v1  ;;  %v1327_v4 = vld [vmem:[%s528_s17] sm:$0xff]  ;;  %v612_v18 = vld [vmem:[%s1540_s4 + $0x30] sm:$0xff]  ;;  %v611_v20 = vld [vmem:[%s1540_s4 + $0x28] sm:$0xff]  ;;  %s1168_s19 = smov 64   ;;  %s937_s17 = scalar_lea.hbm %s1552_s16, %s1278_s25 }
  0x1d   : > { %628 = vmatpush.msra.mxu1 %v619_v7  ;;  %v1074_v11 = vld [vmem:[%s1539_s3] ss:$0 sm:$0xff]  ;;  %v609_v24 = vld [vmem:[%s1540_s4 + $0x18] sm:$0xff]  ;;  %v608_v25 = vld [vmem:[%s1540_s4 + $0x10] sm:$0xff]  ;;  %s524_s28 = scalar_lea.vmem [#allocation2], %s523_s2  ;;  %s941_s29 = sshll.u32 %s937_s17, 4  ;;  %s942_s29 = int_to_ptr.hbm [resolvable:$true] %s941_s29 }
  0x1e   : > { %560 = vmatpush.msra.mxu2 %v535_v2  ;;  %v614_v14 = vld [vmem:[%s1540_s4 + $0x40] sm:$0xff]  ;;  %v607_v26 = vld [vmem:[%s1540_s4 + $0x8] sm:$0xff]  ;;  %s939_s30 = sshll.u32 %s524_s28, 4  ;;  %s1118_s27 = scalar_lea.hbm %s1552_s16, 2  ;;  %s940_s30 = int_to_ptr.vmem [resolvable:$true] %s939_s30 }
  0x1f   : > { %629 = vmatpush.msra.mxu1 %v618_v8  ;;  %v610_v22 = vld [vmem:[%s1540_s4 + $0x20] sm:$0xff] }
  0x20   : > { %561 = vmatpush.msra.mxu2 %v534_v3  ;;  %v606_v27 = vld [vmem:[%s1540_s4] sm:$0xff] }
  0x21   : > { %1014 = vmatmul.msk.f32.vlgmr.msra.gmra.mxu2 %vm542_vm0, %v1327_v4  ;;  %630 = vmatpush.msra.mxu1 %v617_v9  ;;  %v1075_v59 = vld [vmem:[%s1541_s5] ss:$0 sm:$0xff] }
  0x23   : > { %631 = vmatpush.msra.mxu1 %v616_v10 }
  0x25   : > { %632 = vmatpush.msra.mxu1 %v615_v12 }
  0x27   : > { %633 = vmatpush.msra.mxu1 %v614_v14  ;;  %v687_v14 = vld [vmem:[%s1544_s8 + $0x8] sm:$0xff] }
  0x29   : > { %634 = vmatpush.msra.mxu1 %v613_v16 }
  0x2b   : > { %635 = vmatpush.msra.mxu1 %v612_v18 }
  0x2d   : > { %636 = vmatpush.msra.mxu1 %v611_v20 }
  0x2f   : > { %637 = vmatpush.msra.mxu1 %v610_v22 }
  0x31   : > { %638 = vmatpush.msra.mxu1 %v609_v24 }
  0x33   : > { %639 = vmatpush.msra.mxu1 %v608_v25  ;;  %v1076_v25 = vld [vmem:[%s1542_s6] ss:$0 sm:$0xff] }
  0x35   : > { %640 = vmatpush.msra.mxu1 %v607_v26 }
  0x37   : > { %641 = vmatpush.msra.mxu1 %v606_v27 }
  0xa4   : > { %v563_v13 = vpop.f32.mrf.mxu2 }
  0xa5   : > { %v564_v15 = vadd.f32 %v1074_v11, %v563_v13  ;;  %v688_v13 = vld [vmem:[%s1544_s8 + $0x10] sm:$0xff] }
  0xa7   : > { %v567_v17 = vmul.f32 0.70710677, %v564_v15  ;;  %v566_v56 = vmul.f32 0.5, %v564_v15  ;;  %v686_v15 = vld [vmem:[%s1544_s8] sm:$0xff] }
  0xa9   : > { %v570_v19 = vand.u32 2147483647, %v567_v17  ;;  %vm568_vm5 = vcmp.ge.f32.partialorder %v567_v17, 0.0 }
  0xaa   : > { %v569_v54 = vsel %vm568_vm5, 1.0, %v1162_v53 }
  0xab   : > { %v571_v21 = vmul.f32 0.3275911, %v570_v19  ;;  %v597_v37 = vsub.f32 0.0, %v570_v19 }
  0xad   : > { %v572_v23 = vadd.f32 1.0, %v571_v21  ;;  %v598_v41 = vmul.f32 %v597_v37, %v570_v19  ;;  %v1078_v37 = vld [vmem:[%s1545_s9] ss:$0 sm:$0xff] }
  0xaf   : > { %1080 = vrcp.f32 %v572_v23  ;;  %v584_v31 = vand.u32 2147483648, %v572_v23  ;;  %v582_v33 = vand.u32 2147483647, %v572_v23  ;;  %vm578_vm2 = vweird.f32 %v572_v23 }
  0xb0   : > { %v599_v44 = vmul.f32 1.442695, %v598_v41  ;;  %v1079_v41 = vld [vmem:[%s1547_s11] ss:$0 sm:$0xff] }
  0xb1   : > { %v585_v35 = vor.u32 1.1754944e-38, %v584_v31  ;;  %vm583_vm4 = vcmp.eq.f32.partialorder %v582_v33, 8.507059e+37  ;;  %v721_v31 = vld [vmem:[%s1546_s10 + $0x18] sm:$0xff]  ;;  %v719_v33 = vld [vmem:[%s1546_s10 + $0x8] sm:$0xff] }
  0xb2   : > { %1082 = vpow2.f32 %v599_v44  ;;  %741 = vmatpush.msra.mxu3 %v721_v31 }
  0xb3   : > { %1084 = vrcp.f32 %v1163_v0 }
  0xb5   : > { %v1081_v28 = vpop.eup %1080 }
  0xb6   : > { %v574_v29 = vmul.f32 %v1081_v28, %v572_v23  ;;  %vm579_vm1 = vweird.f32 %v1081_v28 }
  0xb7   : > { %vm580_vm3 = vmor %vm578_vm2, %vm579_vm1  ;;  %vm854_vm1 = vcmask 785408   ;;  %vm858_vm2 = vcmask 1040384  }
  0xb8   : > { %v575_v30 = vsub.f32 1.0, %v574_v29  ;;  %v1083_v50 = vpop.eup %1082 }
  0xb9   : > { %v1085_v1 = vpop.eup %1084 }
  0xba   : > { %v576_v32 = vmul.f32 %v1081_v28, %v575_v30  ;;  %v653_v2 = vmul.f32 32.0, %v1085_v1  ;;  %vm657_vm6 = vweird.f32 %v1085_v1 }
  0xbc   : > { %v577_v34 = vadd.f32 %v1081_v28, %v576_v32  ;;  %v654_v3 = vsub.f32 1.0, %v653_v2  ;;  %v720_v32 = vld [vmem:[%s1546_s10 + $0x10] sm:$0xff] }
  0xbd   : > { %742 = vmatpush.msra.mxu3 %v720_v32 }
  0xbe   : > { %v581_v36 = vsel %vm580_vm3, %v1081_v28, %v577_v34  ;;  %v655_v5 = vmul.f32 %v1085_v1, %v654_v3  ;;  %v1077_v28 = vld [vmem:[%s1543_s7] ss:$0 sm:$0xff] }
  0xbf   : > { %v586_v38 = vsel %vm583_vm4, %v585_v35, %v581_v36  ;;  %v718_v34 = vld [vmem:[%s1546_s10] sm:$0xff]  ;;  %743 = vmatpush.msra.mxu3 %v719_v33  ;;  %v1164_v36 = vmov 0  }
  0xc0   : > { %v588_v39 = vmul.f32 1.0614054, %v586_v38  ;;  %v656_v6 = vadd.f32 %v1085_v1, %v655_v5  ;;  %v749_v35 = vld [vmem:[%s532_s20] sm:$0xff]  ;;  %1068 = vset.pattern.permute.xlu1 %v1164_v36  ;;  %1072 = vset.pattern.permute.xlu0 %v1164_v36 }
  0xc1   : > { %744 = vmatpush.msra.mxu3 %v718_v34  ;;  %752 = vperm.xlu1 %1068, %v749_v35  }
  0xc2   : > { %v589_v40 = vadd.f32 -1.4531521, %v588_v39  ;;  %v658_v7 = vsel %vm657_vm6, %v1085_v1, %v656_v6 }
  0xc4   : > { %v590_v42 = vmul.f32 %v589_v40, %v586_v38 }
  0xc6   : > { %v591_v43 = vadd.f32 1.4214138, %v590_v42 }
  0xc8   : > { %v592_v45 = vmul.f32 %v591_v43, %v586_v38 }
  0xca   : > { %v593_v46 = vadd.f32 -0.28449672, %v592_v45 }
  0xcc   : > { %v594_v47 = vmul.f32 %v593_v46, %v586_v38 }
  0xce   : > { %v595_v48 = vadd.f32 0.2548296, %v594_v47 }
  0xd0   : > { %v596_v49 = vmul.f32 %v595_v48, %v586_v38 }
  0xd2   : > { %v601_v51 = vmul.f32 %v1083_v50, %v596_v49 }
  0xd4   : > { %v602_v52 = vsub.f32 1.0, %v601_v51  ;;  %v1165_v51 = vmov 2  }
  0xd5   : > { %1070 = vset.pattern.permute.xlu2 %v1165_v51 }
  0xd6   : > { %v603_v55 = vmul.f32 %v602_v52, %v569_v54  ;;  %v1166_v52 = vmov 1  }
  0xd7   : > { %1069 = vset.pattern.permute.xlu1 %v1166_v52 }
  0xd8   : > { %v604_v57 = vadd.f32 1.0, %v603_v55 }
  0xda   : > { %v605_v58 = vmul.f32 %v604_v57, %v566_v56 }
  0xdc   : > { %642 = vmatmul.f32.vlgmr.msra.gmra.mxu1 %v605_v58 }
 0x133   : > { %v753_v43 = vpop.permute.xlu1 %752 }
 0x159   : > { %v643_v60 = vpop.f32.mrf.mxu1 }
 0x15a   : > { %v644_v61 = vadd.f32 %v1075_v59, %v643_v60 }
 0x15c   : > { %v646_v62 = vadd.f32 %v644_v61, %v1327_v4  ;;  %v689_v4 = vld [vmem:[%s1544_s8 + $0x18] sm:$0xff] }
 0x15d   : > { %709 = vmatpush.msrb.mxu2 %v689_v4 }
 0x15e   : > { %v649_v63 = vsel %vm542_vm0, %v646_v62, 0.0 }
 0x15f   : > { %650 = vadd.xlane.f32.xlu0 %v649_v63  ;;  %710 = vmatpush.msrb.mxu2 %v688_v13  ;;  %v1167_v13 = vmov 3  }
 0x161   : > { %711 = vmatpush.msrb.mxu2 %v687_v14 }
 0x163   : > { %712 = vmatpush.msrb.mxu2 %v686_v15 }
 0x1d2   : > { %v651_v8 = vpop.xlane.xlu0 %650 }
 0x1d3   : > { %v659_v9 = vmul.f32 %v658_v7, %v651_v8 }
 0x1d5   : > { %v660_v10 = vsub.f32 %v646_v62, %v659_v9 }
 0x1d7   : > { %v661_v11 = vmul.f32 %v660_v10, %v660_v10 }
 0x1d9   : > { %v662_v12 = vsel %vm542_vm0, %v661_v11, 0.0 }
 0x1da   : > { %663 = vadd.xlane.f32.xlu0 %v662_v12 }
 0x24d   : > { %v664_v16 = vpop.xlane.xlu0 %663 }
 0x24e   : > { %v665_v17 = vmul.f32 %v664_v16, %v658_v7 }
 0x250   : > { %v666_v18 = vadd.f32 1e-05, %v665_v17 }
 0x252   : > { %1086 = vrsqrt.f32 %v666_v18  ;;  %vm673_vm8 = vweird.f32 %v666_v18 }
 0x258   : > { %v1087_v19 = vpop.eup %1086 }
 0x259   : > { %v668_v20 = vmul.f32 %v1087_v19, %v666_v18  ;;  %vm674_vm7 = vweird.f32 %v1087_v19 }
 0x25a   : > { %vm675_vm9 = vmor %vm673_vm8, %vm674_vm7 }
 0x25b   : > { %v669_v21 = vmul.f32 %v1087_v19, %v668_v20 }
 0x25d   : > { %v670_v22 = vmul.f32 0.5, %v669_v21 }
 0x25f   : > { %v671_v23 = vsub.f32 1.5, %v670_v22 }
 0x261   : > { %v672_v24 = vmul.f32 %v1087_v19, %v671_v23 }
 0x263   : > { %v676_v26 = vsel %vm675_vm9, %v1087_v19, %v672_v24 }
 0x264   : > { %v677_v27 = vmul.f32 %v676_v26, %v660_v10 }
 0x266   : > { %v681_v29 = vmul.f32 %v1076_v25, %v677_v27 }
 0x268   : > { %v1406_v30 = vadd.f32 %v1077_v28, %v681_v29 }
 0x26a   : > { %1015 = vmatmul.msk.f32.vlgmr.msrb.gmra.mxu2 %vm542_vm0, %v1406_v30 }
 0x2ed   : > { %v714_v38 = vpop.f32.mrf.mxu2 }
 0x2ee   : > { %v715_v39 = vadd.f32 %v1078_v37, %v714_v38 }
 0x2f0   : > { %1088 = vtanh.f32 %v715_v39 }
 0x2f6   : > { %v1089_v40 = vpop.eup %1088 }
 0x2f7   : > { %1016 = vmatmul.msk.f32.vlgmr.msra.gmra.mxu3 %vm542_vm0, %v1089_v40 }
 0x37a   : > { %v746_v42 = vpop.f32.mrf.mxu3 }
 0x37b   : > { %v747_v44 = vadd.f32 %v1079_v41, %v746_v42 }
 0x37d   : > { %v755_v45 = vadd.f32 %v753_v43, %v747_v44 }
 0x37f   : > { %v756_v46 = vmul.f32 0.17677669, %v755_v45 }
 0x381   : > { %v758_v47 = vsel %vm757_vm10, %v756_v46, -inf }
 0x382   : > { %v759_v48 = vrot.slane %v758_v47, 4 }
 0x384   : > { %v760_v49 = vmax.f32 %v758_v47, %v759_v48 }
 0x386   : > { %v761_v50 = vrot.slane %v760_v49, 2 }
 0x388   : > { %v762_v53 = vmax.f32 %v760_v49, %v761_v50 }
 0x38a   : > { %v763_v54 = vrot.slane %v762_v53, 1 }
 0x38c   : > { %v764_v55 = vmax.f32 %v762_v53, %v763_v54 }
 0x38e   : > { %v765_v56 = vsub.f32 %v756_v46, %v764_v55 }
 0x390   : > { %v766_v57 = vmul.f32 1.442695, %v765_v56 }
 0x392   : > { %1090 = vpow2.f32 %v766_v57  ;;  %v1171_v57 = vmov 128.0  }
 0x398   : > { %v1091_v58 = vpop.eup %1090 }
 0x399   : > { %v768_v59 = vsel %vm757_vm10, %v1091_v58, 0.0 }
 0x39a   : > { %v769_v60 = vrot.slane %v768_v59, 4 }
 0x39c   : > { %v770_v61 = vadd.f32 %v769_v60, %v768_v59  ;;  %v904_v59 = vld [vmem:[%s1550_s14 + $0x70] sm:$0xff] }
 0x39e   : > { %v771_v62 = vrot.slane %v770_v61, 2 }
 0x3a0   : > { %v772_v63 = vadd.f32 %v771_v62, %v770_v61 }
 0x3a2   : > { %v773_v0 = vrot.slane %v772_v63, 1 }
 0x3a4   : > { %v774_v1 = vadd.f32 %v773_v0, %v772_v63 }
 0x3a6   : > { %1092 = vrcp.f32 %v774_v1  ;;  %v786_v6 = vand.u32 2147483648, %v774_v1  ;;  %v784_v8 = vand.u32 2147483647, %v774_v1  ;;  %vm780_vm12 = vweird.f32 %v774_v1 }
 0x3a7   : > { %1094 = vrcp.f32 %v1171_v57 }
 0x3a8   : > { %v787_v10 = vor.u32 1.1754944e-38, %v786_v6  ;;  %vm785_vm14 = vcmp.eq.f32.partialorder %v784_v8, 8.507059e+37  ;;  %v903_v8 = vld [vmem:[%s1550_s14 + $0x68] sm:$0xff] }
 0x3ac   : > { %v1093_v2 = vpop.eup %1092 }
 0x3ad   : > { %v776_v3 = vmul.f32 %v1093_v2, %v774_v1  ;;  %vm781_vm11 = vweird.f32 %v1093_v2  ;;  %v1095_v60 = vpop.eup %1094 }
 0x3ae   : > { %vm782_vm13 = vmor %vm780_vm12, %vm781_vm11  ;;  %v863_v61 = vmul.f32 128.0, %v1095_v60 }
 0x3af   : > { %v777_v5 = vsub.f32 1.0, %v776_v3 }
 0x3b0   : > { %v864_v62 = vsub.f32 1.0, %v863_v61 }
 0x3b1   : > { %v778_v7 = vmul.f32 %v1093_v2, %v777_v5 }
 0x3b2   : > { %v865_v63 = vmul.f32 %v1095_v60, %v864_v62 }
 0x3b3   : > { %v779_v9 = vadd.f32 %v1093_v2, %v778_v7 }
 0x3b4   : > { %v866_v0 = vadd.f32 %v1095_v60, %v865_v63 }
 0x3b5   : > { %v783_v11 = vsel %vm782_vm13, %v1093_v2, %v779_v9  ;;  %v902_v9 = vld [vmem:[%s1550_s14 + $0x60] sm:$0xff] }
 0x3b6   : > { %v788_v12 = vsel %vm785_vm14, %v787_v10, %v783_v11  ;;  %v901_v10 = vld [vmem:[%s1550_s14 + $0x58] sm:$0xff]  ;;  %v900_v11 = vld [vmem:[%s1550_s14 + $0x50] sm:$0xff] }
 0x3b7   : > { %v789_v4 = vmul.f32 %v1091_v58, %v788_v12  ;;  %v905_v58 = vld [vmem:[%s1550_s14 + $0x78] sm:$0xff]  ;;  %v899_v12 = vld [vmem:[%s1550_s14 + $0x48] sm:$0xff] }
 0x3b8   : > { %907 = vmatpush.msra.mxu0 %v905_v58 }
 0x3b9   : > { %792 = vperm.xlu0 %1072, %v789_v4   ;;  %816 = vperm.xlu2 %1070, %v789_v4  }
 0x3ba   : > { %804 = vperm.xlu1 %1069, %v789_v4   ;;  %908 = vmatpush.msra.mxu0 %v904_v59 }
 0x3bc   : > { %909 = vmatpush.msra.mxu0 %v903_v8 }
 0x3be   : > { %910 = vmatpush.msra.mxu0 %v902_v9 }
 0x3c0   : > { %911 = vmatpush.msra.mxu0 %v901_v10 }
 0x3c1   : > { %1071 = vset.pattern.permute.xlu2 %v1167_v13  ;;  %1073 = vset.pattern.permute.xlu0 %v1167_v13  ;;  %v897_v13 = vld [vmem:[%s1550_s14 + $0x38] sm:$0xff] }
 0x3c2   : > { %828 = vperm.xlu2 %1071, %v789_v4   ;;  %912 = vmatpush.msra.mxu0 %v900_v11  ;;  %v898_v4 = vld [vmem:[%s1550_s14 + $0x40] sm:$0xff] }
 0x3c4   : > { %913 = vmatpush.msra.mxu0 %v899_v12 }
 0x3c6   : > { %914 = vmatpush.msra.mxu0 %v898_v4 }
 0x3c8   : > { %915 = vmatpush.msra.mxu0 %v897_v13 }
 0x413   : > { %v817_v14 = vpop.permute.xlu2 %816 }
 0x414   : > { %v819_v15 = vmul.f32 %v817_v14, %v1406_v30  ;;  %v896_v14 = vld [vmem:[%s1550_s14 + $0x30] sm:$0xff] }
 0x415   : > { %916 = vmatpush.msra.mxu0 %v896_v14 }
 0x416   : > { %v820_v16 = vsel %vm542_vm0, %v819_v15, 0.0  ;;  %v895_v15 = vld [vmem:[%s1550_s14 + $0x28] sm:$0xff] }
 0x417   : > { %v821_v17 = vrot.slane %v820_v16, 4  ;;  %917 = vmatpush.msra.mxu0 %v895_v15 }
 0x419   : > { %v822_v18 = vadd.f32 %v821_v17, %v820_v16  ;;  %v894_v16 = vld [vmem:[%s1550_s14 + $0x20] sm:$0xff]  ;;  %v893_v17 = vld [vmem:[%s1550_s14 + $0x18] sm:$0xff] }
 0x41a   : > { %918 = vmatpush.msra.mxu0 %v894_v16 }
 0x41b   : > { %v823_v19 = vrot.slane %v822_v18, 2 }
 0x41c   : > { %v829_v23 = vpop.permute.xlu2 %828  ;;  %919 = vmatpush.msra.mxu0 %v893_v17 }
 0x41d   : > { %v824_v20 = vadd.f32 %v823_v19, %v822_v18  ;;  %v831_v24 = vmul.f32 %v829_v23, %v1406_v30  ;;  %v892_v18 = vld [vmem:[%s1550_s14 + $0x10] sm:$0xff]  ;;  %v891_v19 = vld [vmem:[%s1550_s14 + $0x8] sm:$0xff] }
 0x41e   : > { %920 = vmatpush.msra.mxu0 %v892_v18 }
 0x41f   : > { %v825_v21 = vrot.slane %v824_v20, 1  ;;  %v832_v25 = vsel %vm542_vm0, %v831_v24, 0.0 }
 0x420   : > { %v833_v28 = vrot.slane %v832_v25, 4  ;;  %921 = vmatpush.msra.mxu0 %v891_v19 }
 0x421   : > { %v826_v22 = vadd.f32 %v825_v21, %v824_v20  ;;  %v890_v20 = vld [vmem:[%s1550_s14] sm:$0xff] }
 0x422   : > { %v834_v32 = vadd.f32 %v833_v28, %v832_v25  ;;  %922 = vmatpush.msra.mxu0 %v890_v20 }
 0x423   : > { %844 = vrot.lane.b32.xlu2 %v826_v22, %s1168_s19  ;;  %s929_s19 = scalar_lea.sflag [#allocation3], %s523_s2 }
 0x424   : > { %v835_v35 = vrot.slane %v834_v32, 2 }
 0x426   : > { %v836_v38 = vadd.f32 %v835_v35, %v834_v32 }
 0x428   : > { %v837_v40 = vrot.slane %v836_v38, 1 }
 0x42a   : > { %v838_v41 = vadd.f32 %v837_v40, %v836_v38 }
 0x42b   : > { %v793_v42 = vpop.permute.xlu0 %792 }
 0x42c   : > { %v805_v26 = vpop.permute.xlu1 %804  ;;  %v795_v43 = vmul.f32 %v793_v42, %v1406_v30 }
 0x42d   : > { %v807_v27 = vmul.f32 %v805_v26, %v1406_v30 }
 0x42e   : > { %v796_v44 = vsel %vm542_vm0, %v795_v43, 0.0 }
 0x42f   : > { %v808_v29 = vsel %vm542_vm0, %v807_v27, 0.0  ;;  %v797_v45 = vrot.slane %v796_v44, 4 }
 0x430   : > { %v809_v31 = vrot.slane %v808_v29, 4 }
 0x431   : > { %v798_v46 = vadd.f32 %v797_v45, %v796_v44 }
 0x432   : > { %v810_v33 = vadd.f32 %v809_v31, %v808_v29  ;;  %v856_v31 = vld [vmem:[%s1548_s12] sm:$0x1] }
 0x433   : > { %v799_v47 = vrot.slane %v798_v46, 2 }
 0x434   : > { %v811_v34 = vrot.slane %v810_v33, 2 }
 0x435   : > { %v800_v48 = vadd.f32 %v799_v47, %v798_v46 }
 0x436   : > { %v812_v36 = vadd.f32 %v811_v34, %v810_v33  ;;  %v857_v34 = vld [vmem:[%s1549_s13] sm:$0x1] }
 0x437   : > { %v801_v49 = vrot.slane %v800_v48, 1 }
 0x438   : > { %v813_v37 = vrot.slane %v812_v36, 1 }
 0x439   : > { %v802_v51 = vadd.f32 %v801_v49, %v800_v48 }
 0x43a   : > { %v814_v39 = vadd.f32 %v813_v37, %v812_v36  ;;  %v906_v37 = vld [vmem:[%s1551_s15] sm:$0x1] }
 0x43c   : > { %840 = vrot.lane.b32.xlu1 %v814_v39, %s1169_s23  ;;  %s1112_s23 = sshra.s32 %s942_s29, 4  ;;  %s1113_s23 = int_to_ptr.hbm [resolvable:$true] %s1112_s23 }
 0x43d   : > { %p1119_p0 = scmp.lt.s32.totalorder %s1113_s23, %s1552_s16 }
 0x444   : > { %848 = vrot.lane.b32.xlu1 %v838_v41, %s1170_s18  ;;  %s1114_s18 = scalar_lea.hbm %s1113_s23, 1 }
 0x445   : > { %p1115_p11 = scmp.ne.s32.totalorder %s1113_s23, %s1114_s18  ;;  %p1120_p1 = scmp.lt.s32.totalorder %s1118_s27, %s1114_s18 }
 0x447   : > { %p1116_p12 = pnand %p1115_p11, %p1295_p5  ;;  %p1121_p2 = por %p1120_p1, %p1119_p0 }
 0x449   : > { %p1117_p13 = pneg %p1116_p12 }
 0x44b   : > { %p1122_p3 = pnand %p1121_p2, %p1117_p13 }
 0x47d   : > { %v845_v53 = vpop.permute.xlu2 %844 }
 0x4ae   : > { %v841_v50 = vpop.permute.xlu1 %840 }
 0x4af   : > { %v851_v52 = vsel %vm542_vm0, %v802_v51, %v841_v50  ;;  %vm867_vm0 = vweird.f32 %v1095_v60 }
 0x4b0   : > { %v853_v55 = vsel %vm852_vm15, %v851_v52, %v845_v53  ;;  %v868_v1 = vsel %vm867_vm0, %v1095_v60, %v866_v0 }
 0x4b6   : > { %v849_v54 = vpop.permute.xlu1 %848 }
 0x4b7   : > { %v855_v56 = vsel %vm854_vm1, %v853_v55, %v849_v54 }
 0x4b8   : > { %v859_v30 = vsel %vm858_vm2, %v855_v56, 0.0 }
 0x4b9   : > { %860 = vadd.xlane.f32.xlu2 %v859_v30 }
 0x52c   : > { %v861_v2 = vpop.xlane.xlu2 %860 }
 0x52d   : > { %v869_v3 = vmul.f32 %v868_v1, %v861_v2 }
 0x52f   : > { %v870_v5 = vsub.f32 %v855_v56, %v869_v3 }
 0x531   : > { %v871_v6 = vmul.f32 %v870_v5, %v870_v5 }
 0x533   : > { %v872_v7 = vsel %vm858_vm2, %v871_v6, 0.0 }
 0x534   : > { %873 = vadd.xlane.f32.xlu1 %v872_v7 }
 0x5a7   : > { %v874_v21 = vpop.xlane.xlu1 %873 }
 0x5a8   : > { %v875_v22 = vmul.f32 %v874_v21, %v868_v1 }
 0x5aa   : > { %v876_v23 = vadd.f32 1e-05, %v875_v22 }
 0x5ac   : > { %1096 = vrsqrt.f32 %v876_v23  ;;  %vm883_vm4 = vweird.f32 %v876_v23 }
 0x5b2   : > { %v1097_v24 = vpop.eup %1096 }
 0x5b3   : > { %v878_v25 = vmul.f32 %v1097_v24, %v876_v23  ;;  %vm884_vm3 = vweird.f32 %v1097_v24 }
 0x5b4   : > { %vm885_vm5 = vmor %vm883_vm4, %vm884_vm3 }
 0x5b5   : > { %v879_v26 = vmul.f32 %v1097_v24, %v878_v25 }
 0x5b7   : > { %v880_v27 = vmul.f32 0.5, %v879_v26 }
 0x5b9   : > { %v881_v28 = vsub.f32 1.5, %v880_v27 }
 0x5bb   : > { %v882_v29 = vmul.f32 %v1097_v24, %v881_v28 }
 0x5bd   : > { %v886_v32 = vsel %vm885_vm5, %v1097_v24, %v882_v29 }
 0x5be   : > { %v887_v33 = vmul.f32 %v886_v32, %v870_v5 }
 0x5c0   : > { %v888_v35 = vmul.f32 %v887_v33, %v856_v31 }
 0x5c2   : > { %v889_v36 = vadd.f32 %v888_v35, %v857_v34 }
 0x5c4   : > { %923 = vmatmul.f32.vlgmr.msra.gmra.mxu0 %v889_v36 }
 0x641   : > { %v924_v38 = vpop.f32.mrf.mxu0 }
 0x642   : > { %v925_v39 = vadd.f32 %v924_v38, %v906_v37 }
 0x644   : > { %927 = vst [vmem:[%s524_s28] sm:$0x1] %v925_v39 }
 0x645   : > { %1125 = shalt.err (!%p1122_p3)
}
 0x646   : > { %1019 = dma.vmem_to_hbm [thread:$0]  (%p1295_p5), %s940_s30, 16, %s942_s29, %s929_s19  }
 0x647 PF: > { %s1569_s2 = sld [smem:[#allocation5_spill]]  ;;  %p1025_p4 = scmp.ge.s32.totalorder %s1160_s24, 2 }
 0x649   : > { %p1022_p7 = pnand %p1025_p4, %p1299_p6 }
 0x64b   : > { %p1023_p8 = pneg %p1022_p7 }
 0x64d   : > { %s953_s28 = sand.u32 1, %s1569_s2  }
 0x64e   : > { %s954_s25 = scalar_lea.sflag [#allocation3], %s953_s28 }
 0x64f   : > { %1143 = dma.done.wait (%p1023_p8), %s954_s25, 16  }
 0x650   : > { %1145 = vsyncadd (%p1023_p8), %s954_s25, 4294967280  ;;  %s1571_s24 = sld [smem:[#allocation7_spill]]  ;;  %s1574_s21 = smov %s1152_s22 }
 0x651   : > { %s1572_s23 = sld [smem:[#allocation6_spill]] }
 0x652   : > { %s1573_s18 = sld [smem:[#allocation8_spill]] }
 0x656   : > { %p26_p9 = scmp.ge.s32.totalorder %s1571_s24, 4  }
 0x657   : > { %s1575_s22 = smov %s1572_s23 }
 0x658   : > { %s1576_s23 = smov %s1573_s18  ;;  %28 = sbr.rel (!%p26_p9) target bundleno = 6 (0x6), region = 122 }
 0x65d   :  { %959 = vsyncpa [#allocation3], 1 }
 0x65e   :  { %961 = vsyncpa [#allocation3 + $0x1], 1 }

</bundles_post_ra>
